<compile_context>
chip_gen: v6e
topology: v6e:2x2x1
jax: 0.10.0
libtpu: 0.0.40
codegen_flags: <defaults>
</compile_context>

<pallas_src>
import functools

import jax
import jax.numpy as jnp
from jax.experimental import pallas as pl
from jax.experimental.pallas import tpu as pltpu


def _qkv_proj_kernel(q_ref, k_ref, v_ref,
                     wq_ref, bq_ref, wk_ref, bk_ref, wv_ref, bv_ref,
                     qh_ref, kh_ref, vh_ref,
                     *, num_heads, head_dim, scale):
    """Project one (ts, H) tile of q/k/v and emit head-major (heads, ts, d)."""
    d = head_dim

    def project(x_ref, w_ref, b_ref, out_ref, s):
        x = x_ref[0]                                               # (ts, H)
        y = jnp.dot(x, w_ref[...], preferred_element_type=jnp.float32)
        y = y + b_ref[...]
        if s != 1.0:
            y = y * s
        y = y.astype(out_ref.dtype)
        # Head split: h static lane slices, executed once per (batch, seq-tile)
        # grid point (amortized -- NOT inside the flash hot loop).
        for i in range(num_heads):
            out_ref[0, i] = y[:, i * d:(i + 1) * d]

    project(q_ref, wq_ref, bq_ref, qh_ref, scale)   # 1/sqrt(d) folded into Q
    project(k_ref, wk_ref, bk_ref, kh_ref, 1.0)
    project(v_ref, wv_ref, bv_ref, vh_ref, 1.0)


def _flash_kernel(qh_ref, kh_ref, vh_ref, wo_ref, bo_ref,
                  o_ref,
                  m_sc, l_sc, acc_sc,
                  *, num_heads):
    kv = pl.program_id(2)
    nkv = pl.num_programs(2)
    dt = qh_ref.dtype

    @pl.when(kv == 0)
    def _init():
        m_sc[...] = jnp.full(m_sc.shape, -jnp.inf, dtype=m_sc.dtype)
        l_sc[...] = jnp.zeros(l_sc.shape, dtype=l_sc.dtype)
        acc_sc[...] = jnp.zeros(acc_sc.shape, dtype=acc_sc.dtype)

    # One head at a time: only a single (TQ, TK) f32 score / prob tile is live,
    # keeping values in the vreg file instead of spilling to VMEM.
    for i in range(num_heads):
        q_i = qh_ref[0, i]                            # (TQ, d), pre-scaled
        k_i = kh_ref[0, i]                            # (TK, d)
        v_i = vh_ref[0, i]                            # (TK, d)

        # Contract on the last axis of both operands -> no materialized K^T.
        s = jax.lax.dot_general(q_i, k_i, (((1,), (1,)), ((), ())),
                                preferred_element_type=jnp.float32)  # (TQ, TK)

        m_prev = m_sc[i]                              # (TQ, 1) f32
        m_new = jnp.maximum(m_prev, jnp.max(s, axis=-1, keepdims=True))
        alpha = jnp.exp(m_prev - m_new)
        p = jnp.exp(s - m_new)                        # (TQ, TK) f32
        l_sc[i] = alpha * l_sc[i] + jnp.sum(p, axis=-1, keepdims=True)
        acc_sc[i] = alpha * acc_sc[i] + jnp.dot(
            p.astype(dt), v_i, preferred_element_type=jnp.float32)
        m_sc[i] = m_new

    @pl.when(kv == nkv - 1)
    def _finalize():
        # Exact normalization (once per query tile -> essentially free).
        ctx = acc_sc[...] / l_sc[...]                 # (h, TQ, d) f32
        # (h, TQ, d) -> (TQ, H): single lane relayout per query tile.
        ctx2 = jnp.concatenate([ctx[i] for i in range(num_heads)], axis=-1)
        out = jnp.dot(ctx2.astype(dt), wo_ref[...],
                      preferred_element_type=jnp.float32) + bo_ref[...]
        o_ref[0] = out.astype(o_ref.dtype)            # lane-dense (TQ, H) store


def _vmem_limit(estimate_bytes, override):
    if override is not None:
        return int(override)
    # Actual tile/weight/scratch sum + headroom for Mosaic internal scratch.
    # Kept below the v7x 64 MiB physical VMEM; raise (e.g. to ~96 MiB) on the
    # 128 MiB v5e/v6e parts if you want larger KV tiles / resident K,V.
    return int(min(max(estimate_bytes + (16 << 20), 24 << 20), 48 << 20))


def multi_head_attention(q, k, v, params, *, head_size,
                         tq=256, tk=256, ts=256, vmem_limit_bytes=None):
    """q, k, v: (B, S, H).  params: dict of (in, out) weights + (1, out) biases.

    NOTE (naming follows the torch module): `head_size` is the NUMBER of heads;
    the per-head ("att") dim is H // head_size.

    H should ideally be a multiple of 128 (lane-dense stores); S must be
    divisible by the (clamped) tile sizes.  On v7x, prefer B * (S // tq) even
    so both TensorCores get balanced work.
    """
    B, S, H = q.shape
    num_heads = head_size
    assert H % num_heads == 0, "hidden_size must be divisible by head_size"
    d = H // num_heads
    dtype = q.dtype
    itm = jnp.dtype(dtype).itemsize
    sub = 8 * (4 // itm)                      # sublane tile: 8 f32 / 16 bf16

    tq, tk, ts = (min(t, S) for t in (tq, tk, ts))
    assert S % tq == 0 and S % tk == 0 and S % ts == 0, \
        "seq length must divide the tile sizes"
    for t in (tq, tk, ts):
        assert t == S or t % sub == 0, (
            f"tile {t} must be a multiple of the {dtype} sublane tile {sub} "
            "or equal the full sequence length")

    # Weights/biases stay VMEM-resident inside the kernels: keep them in the
    # activation dtype (halves the footprint for bf16 activations).
    wq, bq, wk, bk, wv, bv, wo, bo = (
        params[n].astype(dtype)
        for n in ("wq", "bq", "wk", "bk", "wv", "bv", "wo", "bo"))

    scale = float(d) ** (-0.5)

    # ---- Kernel A: Q/K/V projections -> head-major (B, h, S, d) ------------
    proj_kernel = functools.partial(_qkv_proj_kernel, num_heads=num_heads,
                                    head_dim=d, scale=scale)
    x_spec = pl.BlockSpec((1, ts, H), lambda b, si: (b, si, 0))
    w_spec = pl.BlockSpec((H, H), lambda b, si: (0, 0))        # resident
    b_spec = pl.BlockSpec((1, H), lambda b, si: (0, 0))
    h_spec = pl.BlockSpec((1, num_heads, ts, d), lambda b, si: (b, 0, si, 0))
    h_shape = jax.ShapeDtypeStruct((B, num_heads, S, d), dtype)

    proj_bytes = (3 * 2 * ts * H * itm                 # q/k/v tiles (x2 buf)
                  + 3 * 2 * (H * H + H) * itm          # weights + biases
                  + 3 * 2 * num_heads * ts * d * itm)  # head-major outputs
    qh, kh, vh = pl.pallas_call(
        proj_kernel,
        out_shape=(h_shape, h_shape, h_shape),
        grid_spec=pltpu.PrefetchScalarGridSpec(
            num_scalar_prefetch=0,
            grid=(B, S // ts),
            in_specs=[x_spec, x_spec, x_spec,
                      w_spec, b_spec, w_spec, b_spec, w_spec, b_spec],
            out_specs=[h_spec, h_spec, h_spec]),
        compiler_params=pltpu.CompilerParams(
            dimension_semantics=("parallel", "parallel"),
            vmem_limit_bytes=_vmem_limit(proj_bytes, vmem_limit_bytes)),
    )(q, k, v, wq, bq, wk, bk, wv, bv)

    # ---- Kernel B: flash attention + fused output projection ---------------
    flash_kernel = functools.partial(_flash_kernel, num_heads=num_heads)
    q_spec = pl.BlockSpec((1, num_heads, tq, d), lambda b, qi, kv: (b, 0, qi, 0))
    kv_spec = pl.BlockSpec((1, num_heads, tk, d), lambda b, qi, kv: (b, 0, kv, 0))
    wo_spec = pl.BlockSpec((H, H), lambda b, qi, kv: (0, 0))   # resident
    bo_spec = pl.BlockSpec((1, H), lambda b, qi, kv: (0, 0))
    o_spec = pl.BlockSpec((1, tq, H), lambda b, qi, kv: (b, qi, 0))

    flash_bytes = (2 * num_heads * tq * d * itm          # q tile (x2 buf)
                   + 2 * 2 * num_heads * tk * d * itm    # k, v tiles
                   + 2 * (H * H + H) * itm               # Wo + bo
                   + 2 * tq * H * itm                    # output tile
                   + num_heads * tq * 4 * (2 + d))       # f32 m / l / acc
    return pl.pallas_call(
        flash_kernel,
        out_shape=jax.ShapeDtypeStruct((B, S, H), dtype),
        grid_spec=pltpu.PrefetchScalarGridSpec(
            num_scalar_prefetch=0,
            grid=(B, S // tq, S // tk),
            in_specs=[q_spec, kv_spec, kv_spec, wo_spec, bo_spec],
            out_specs=o_spec,
            scratch_shapes=[
                pltpu.VMEM((num_heads, tq, 1), jnp.float32),   # running max
                pltpu.VMEM((num_heads, tq, 1), jnp.float32),   # running sum
                pltpu.VMEM((num_heads, tq, d), jnp.float32),   # accumulator
            ]),
        compiler_params=pltpu.CompilerParams(
            dimension_semantics=("parallel", "parallel", "arbitrary"),
            vmem_limit_bytes=_vmem_limit(flash_bytes, vmem_limit_bytes)),
    )(qh, kh, vh, wo, bo)


def _reference(q, k, v, params, *, head_size):
    """Pure-JAX reference mirroring the PyTorch forward (eval mode)."""
    B, S, H = q.shape
    d = H // head_size
    scale = d ** (-0.5)

    def proj(x, w, b):
        return x @ w + b  # w already (in, out), b (1, out) broadcasts

    qp = proj(q, params["wq"], params["bq"]).reshape(B, S, head_size, d)
    kp = proj(k, params["wk"], params["bk"]).reshape(B, S, head_size, d)
    vp = proj(v, params["wv"], params["bv"]).reshape(B, S, head_size, d)

    qp = jnp.transpose(qp, (0, 2, 1, 3)) * scale     # (B, h, S, d)
    kp = jnp.transpose(kp, (0, 2, 3, 1))             # (B, h, d, S)
    vp = jnp.transpose(vp, (0, 2, 1, 3))             # (B, h, S, d)

    x = jnp.einsum("bhqd,bhdk->bhqk", qp, kp)
    x = jax.nn.softmax(x, axis=3)
    x = jnp.einsum("bhqk,bhkd->bhqd", x, vp)
    x = jnp.transpose(x, (0, 2, 1, 3)).reshape(B, S, H)
    return proj(x, params["wo"], params["bo"])


if __name__ == "__main__":
    B, S, hidden = 2, 8, 128       # hidden = 128 -> lane-dense blocks/stores
    head_size = 4                  # number of heads; per-head dim = 32
    attention_dropout_rate = 0.1   # unused in eval mode

    key = jax.random.PRNGKey(0)
    keys = jax.random.split(key, 12)

    def init_linear(kw, kb, fan_in, fan_out):
        # Deterministic init; torch Linear stores (out, in) -> keep (in, out).
        bound = fan_in ** (-0.5)
        w = jax.random.uniform(kw, (fan_in, fan_out), jnp.float32, -bound, bound)
        b = jax.random.uniform(kb, (1, fan_out), jnp.float32, -bound, bound)
        return w, b

    wq, bq = init_linear(keys[0], keys[1], hidden, hidden)
    wk, bk = init_linear(keys[2], keys[3], hidden, hidden)
    wv, bv = init_linear(keys[4], keys[5], hidden, hidden)
    wo, bo = init_linear(keys[6], keys[7], hidden, hidden)
    params = dict(wq=wq, bq=bq, wk=wk, bk=bk, wv=wv, bv=bv, wo=wo, bo=bo)

    q = jax.random.normal(keys[8], (B, S, hidden), jnp.float32)
    k = jax.random.normal(keys[9], (B, S, hidden), jnp.float32)
    v = jax.random.normal(keys[10], (B, S, hidden), jnp.float32)

    out = multi_head_attention(q, k, v, params, head_size=head_size)
    out = jax.block_until_ready(out)

    ref = _reference(q, k, v, params, head_size=head_size)
    assert out.shape == (B, S, hidden)
    # f32 end-to-end with exact softmax normalization -> error is typically
    # <1e-5; keep a comfortable tolerance for the online-softmax reordering.
    assert jnp.allclose(out, ref, atol=2e-3, rtol=2e-3), \
        float(jnp.max(jnp.abs(out - ref)))

    print("KERNEL_OK")
</pallas_src>

<mosaic_0001>
module attributes {stable_mosaic.version = 11 : i64} {
  func.func @_qkv_proj_kernel(%arg0: i32, %arg1: i32, %arg2: memref<1x8x128xf32, #tpu.memory_space<vmem>>, %arg3: memref<1x8x128xf32, #tpu.memory_space<vmem>>, %arg4: memref<1x8x128xf32, #tpu.memory_space<vmem>>, %arg5: memref<128x128xf32, #tpu.memory_space<vmem>>, %arg6: memref<1x128xf32, #tpu.memory_space<vmem>>, %arg7: memref<128x128xf32, #tpu.memory_space<vmem>>, %arg8: memref<1x128xf32, #tpu.memory_space<vmem>>, %arg9: memref<128x128xf32, #tpu.memory_space<vmem>>, %arg10: memref<1x128xf32, #tpu.memory_space<vmem>>, %arg11: memref<1x4x8x32xf32, #tpu.memory_space<vmem>>, %arg12: memref<1x4x8x32xf32, #tpu.memory_space<vmem>>, %arg13: memref<1x4x8x32xf32, #tpu.memory_space<vmem>>) attributes {dimension_semantics = [#tpu.dimension_semantics<parallel>, #tpu.dimension_semantics<parallel>], iteration_bounds = array<i64: 2, 1>, scalar_prefetch = 0 : i64, scratch_operands = 0 : i64, tpu.core_type = #tpu.core_type<tc>, window_params = [{transform_indices = @transform_0, window_bounds = array<i64: 1, 8, 128>}, {transform_indices = @transform_1, window_bounds = array<i64: 1, 8, 128>}, {transform_indices = @transform_2, window_bounds = array<i64: 1, 8, 128>}, {pipeline_mode = #tpu.pipeline_mode<synchronous>, transform_indices = @transform_3, window_bounds = array<i64: 128, 128>}, {pipeline_mode = #tpu.pipeline_mode<synchronous>, transform_indices = @transform_4, window_bounds = array<i64: 1, 128>}, {pipeline_mode = #tpu.pipeline_mode<synchronous>, transform_indices = @transform_5, window_bounds = array<i64: 128, 128>}, {pipeline_mode = #tpu.pipeline_mode<synchronous>, transform_indices = @transform_6, window_bounds = array<i64: 1, 128>}, {pipeline_mode = #tpu.pipeline_mode<synchronous>, transform_indices = @transform_7, window_bounds = array<i64: 128, 128>}, {pipeline_mode = #tpu.pipeline_mode<synchronous>, transform_indices = @transform_8, window_bounds = array<i64: 1, 128>}, {transform_indices = @transform_9, window_bounds = array<i64: 1, 4, 8, 32>}, {transform_indices = @transform_10, window_bounds = array<i64: 1, 4, 8, 32>}, {transform_indices = @transform_11, window_bounds = array<i64: 1, 4, 8, 32>}]} {
    %c0 = arith.constant 0 : index
    %c0_0 = arith.constant 0 : index
    %c0_1 = arith.constant 0 : index
    %0 = vector.load %arg2[%c0, %c0_0, %c0_1] : memref<1x8x128xf32, #tpu.memory_space<vmem>>, vector<1x8x128xf32>
    %1 = vector.shape_cast %0 : vector<1x8x128xf32> to vector<8x128xf32>
    %c0_2 = arith.constant 0 : index
    %c0_3 = arith.constant 0 : index
    %2 = vector.load %arg5[%c0_2, %c0_3] : memref<128x128xf32, #tpu.memory_space<vmem>>, vector<128x128xf32>
    %cst = arith.constant dense<0.000000e+00> : vector<8x128xf32>
    %3 = tpu.matmul %1, %2, %cst {dimension_numbers = #tpu.dot_dimension_numbers<[1], [0], [0], [1], [0, 0, 1, 1], [], []>} : vector<8x128xf32>, vector<128x128xf32>, vector<8x128xf32> -> vector<8x128xf32>
    %c0_4 = arith.constant 0 : index
    %c0_5 = arith.constant 0 : index
    %4 = vector.load %arg6[%c0_4, %c0_5] : memref<1x128xf32, #tpu.memory_space<vmem>>, vector<1x128xf32>
    %5 = vector.broadcast %4 : vector<1x128xf32> to vector<8x128xf32>
    %6 = arith.addf %3, %5 : vector<8x128xf32>
    %cst_6 = arith.constant 0.176776692 : f32
    %7 = vector.broadcast %cst_6 : f32 to vector<8x128xf32>
    %8 = arith.mulf %6, %7 : vector<8x128xf32>
    %9 = vector.extract_strided_slice %8 {offsets = [0, 0], sizes = [8, 32], strides = [1, 1]} : vector<8x128xf32> to vector<8x32xf32>
    %c0_7 = arith.constant 0 : index
    %c0_8 = arith.constant 0 : index
    %c0_9 = arith.constant 0 : index
    %c0_10 = arith.constant 0 : index
    %10 = vector.load %arg11[%c0_7, %c0_8, %c0_9, %c0_10] : memref<1x4x8x32xf32, #tpu.memory_space<vmem>>, vector<1x1x8x32xf32>
    %11 = vector.shape_cast %10 : vector<1x1x8x32xf32> to vector<8x32xf32>
    %12 = vector.shape_cast %9 : vector<8x32xf32> to vector<1x1x8x32xf32>
    tpu.vector_store %arg11[%c0_7, %c0_8, %c0_9, %c0_10], %12 {strides = array<i32>} : memref<1x4x8x32xf32, #tpu.memory_space<vmem>>, vector<1x1x8x32xf32>,
    %13 = vector.extract_strided_slice %8 {offsets = [0, 32], sizes = [8, 32], strides = [1, 1]} : vector<8x128xf32> to vector<8x32xf32>
    %c0_11 = arith.constant 0 : index
    %c1 = arith.constant 1 : index
    %c0_12 = arith.constant 0 : index
    %c0_13 = arith.constant 0 : index
    %14 = vector.load %arg11[%c0_11, %c1, %c0_12, %c0_13] : memref<1x4x8x32xf32, #tpu.memory_space<vmem>>, vector<1x1x8x32xf32>
    %15 = vector.shape_cast %14 : vector<1x1x8x32xf32> to vector<8x32xf32>
    %16 = vector.shape_cast %13 : vector<8x32xf32> to vector<1x1x8x32xf32>
    tpu.vector_store %arg11[%c0_11, %c1, %c0_12, %c0_13], %16 {strides = array<i32>} : memref<1x4x8x32xf32, #tpu.memory_space<vmem>>, vector<1x1x8x32xf32>,
    %17 = vector.extract_strided_slice %8 {offsets = [0, 64], sizes = [8, 32], strides = [1, 1]} : vector<8x128xf32> to vector<8x32xf32>
    %c0_14 = arith.constant 0 : index
    %c2 = arith.constant 2 : index
    %c0_15 = arith.constant 0 : index
    %c0_16 = arith.constant 0 : index
    %18 = vector.load %arg11[%c0_14, %c2, %c0_15, %c0_16] : memref<1x4x8x32xf32, #tpu.memory_space<vmem>>, vector<1x1x8x32xf32>
    %19 = vector.shape_cast %18 : vector<1x1x8x32xf32> to vector<8x32xf32>
    %20 = vector.shape_cast %17 : vector<8x32xf32> to vector<1x1x8x32xf32>
    tpu.vector_store %arg11[%c0_14, %c2, %c0_15, %c0_16], %20 {strides = array<i32>} : memref<1x4x8x32xf32, #tpu.memory_space<vmem>>, vector<1x1x8x32xf32>,
    %21 = vector.extract_strided_slice %8 {offsets = [0, 96], sizes = [8, 32], strides = [1, 1]} : vector<8x128xf32> to vector<8x32xf32>
    %c0_17 = arith.constant 0 : index
    %c3 = arith.constant 3 : index
    %c0_18 = arith.constant 0 : index
    %c0_19 = arith.constant 0 : index
    %22 = vector.load %arg11[%c0_17, %c3, %c0_18, %c0_19] : memref<1x4x8x32xf32, #tpu.memory_space<vmem>>, vector<1x1x8x32xf32>
    %23 = vector.shape_cast %22 : vector<1x1x8x32xf32> to vector<8x32xf32>
    %24 = vector.shape_cast %21 : vector<8x32xf32> to vector<1x1x8x32xf32>
    tpu.vector_store %arg11[%c0_17, %c3, %c0_18, %c0_19], %24 {strides = array<i32>} : memref<1x4x8x32xf32, #tpu.memory_space<vmem>>, vector<1x1x8x32xf32>,
    %c0_20 = arith.constant 0 : index
    %c0_21 = arith.constant 0 : index
    %c0_22 = arith.constant 0 : index
    %25 = vector.load %arg3[%c0_20, %c0_21, %c0_22] : memref<1x8x128xf32, #tpu.memory_space<vmem>>, vector<1x8x128xf32>
    %26 = vector.shape_cast %25 : vector<1x8x128xf32> to vector<8x128xf32>
    %c0_23 = arith.constant 0 : index
    %c0_24 = arith.constant 0 : index
    %27 = vector.load %arg7[%c0_23, %c0_24] : memref<128x128xf32, #tpu.memory_space<vmem>>, vector<128x128xf32>
    %cst_25 = arith.constant dense<0.000000e+00> : vector<8x128xf32>
    %28 = tpu.matmul %26, %27, %cst_25 {dimension_numbers = #tpu.dot_dimension_numbers<[1], [0], [0], [1], [0, 0, 1, 1], [], []>} : vector<8x128xf32>, vector<128x128xf32>, vector<8x128xf32> -> vector<8x128xf32>
    %c0_26 = arith.constant 0 : index
    %c0_27 = arith.constant 0 : index
    %29 = vector.load %arg8[%c0_26, %c0_27] : memref<1x128xf32, #tpu.memory_space<vmem>>, vector<1x128xf32>
    %30 = vector.broadcast %29 : vector<1x128xf32> to vector<8x128xf32>
    %31 = arith.addf %28, %30 : vector<8x128xf32>
    %32 = vector.extract_strided_slice %31 {offsets = [0, 0], sizes = [8, 32], strides = [1, 1]} : vector<8x128xf32> to vector<8x32xf32>
    %c0_28 = arith.constant 0 : index
    %c0_29 = arith.constant 0 : index
    %c0_30 = arith.constant 0 : index
    %c0_31 = arith.constant 0 : index
    %33 = vector.load %arg12[%c0_28, %c0_29, %c0_30, %c0_31] : memref<1x4x8x32xf32, #tpu.memory_space<vmem>>, vector<1x1x8x32xf32>
    %34 = vector.shape_cast %33 : vector<1x1x8x32xf32> to vector<8x32xf32>
    %35 = vector.shape_cast %32 : vector<8x32xf32> to vector<1x1x8x32xf32>
    tpu.vector_store %arg12[%c0_28, %c0_29, %c0_30, %c0_31], %35 {strides = array<i32>} : memref<1x4x8x32xf32, #tpu.memory_space<vmem>>, vector<1x1x8x32xf32>,
    %36 = vector.extract_strided_slice %31 {offsets = [0, 32], sizes = [8, 32], strides = [1, 1]} : vector<8x128xf32> to vector<8x32xf32>
    %c0_32 = arith.constant 0 : index
    %c1_33 = arith.constant 1 : index
    %c0_34 = arith.constant 0 : index
    %c0_35 = arith.constant 0 : index
    %37 = vector.load %arg12[%c0_32, %c1_33, %c0_34, %c0_35] : memref<1x4x8x32xf32, #tpu.memory_space<vmem>>, vector<1x1x8x32xf32>
    %38 = vector.shape_cast %37 : vector<1x1x8x32xf32> to vector<8x32xf32>
    %39 = vector.shape_cast %36 : vector<8x32xf32> to vector<1x1x8x32xf32>
    tpu.vector_store %arg12[%c0_32, %c1_33, %c0_34, %c0_35], %39 {strides = array<i32>} : memref<1x4x8x32xf32, #tpu.memory_space<vmem>>, vector<1x1x8x32xf32>,
    %40 = vector.extract_strided_slice %31 {offsets = [0, 64], sizes = [8, 32], strides = [1, 1]} : vector<8x128xf32> to vector<8x32xf32>
    %c0_36 = arith.constant 0 : index
    %c2_37 = arith.constant 2 : index
    %c0_38 = arith.constant 0 : index
    %c0_39 = arith.constant 0 : index
    %41 = vector.load %arg12[%c0_36, %c2_37, %c0_38, %c0_39] : memref<1x4x8x32xf32, #tpu.memory_space<vmem>>, vector<1x1x8x32xf32>
    %42 = vector.shape_cast %41 : vector<1x1x8x32xf32> to vector<8x32xf32>
    %43 = vector.shape_cast %40 : vector<8x32xf32> to vector<1x1x8x32xf32>
    tpu.vector_store %arg12[%c0_36, %c2_37, %c0_38, %c0_39], %43 {strides = array<i32>} : memref<1x4x8x32xf32, #tpu.memory_space<vmem>>, vector<1x1x8x32xf32>,
    %44 = vector.extract_strided_slice %31 {offsets = [0, 96], sizes = [8, 32], strides = [1, 1]} : vector<8x128xf32> to vector<8x32xf32>
    %c0_40 = arith.constant 0 : index
    %c3_41 = arith.constant 3 : index
    %c0_42 = arith.constant 0 : index
    %c0_43 = arith.constant 0 : index
    %45 = vector.load %arg12[%c0_40, %c3_41, %c0_42, %c0_43] : memref<1x4x8x32xf32, #tpu.memory_space<vmem>>, vector<1x1x8x32xf32>
    %46 = vector.shape_cast %45 : vector<1x1x8x32xf32> to vector<8x32xf32>
    %47 = vector.shape_cast %44 : vector<8x32xf32> to vector<1x1x8x32xf32>
    tpu.vector_store %arg12[%c0_40, %c3_41, %c0_42, %c0_43], %47 {strides = array<i32>} : memref<1x4x8x32xf32, #tpu.memory_space<vmem>>, vector<1x1x8x32xf32>,
    %c0_44 = arith.constant 0 : index
    %c0_45 = arith.constant 0 : index
    %c0_46 = arith.constant 0 : index
    %48 = vector.load %arg4[%c0_44, %c0_45, %c0_46] : memref<1x8x128xf32, #tpu.memory_space<vmem>>, vector<1x8x128xf32>
    %49 = vector.shape_cast %48 : vector<1x8x128xf32> to vector<8x128xf32>
    %c0_47 = arith.constant 0 : index
    %c0_48 = arith.constant 0 : index
    %50 = vector.load %arg9[%c0_47, %c0_48] : memref<128x128xf32, #tpu.memory_space<vmem>>, vector<128x128xf32>
    %cst_49 = arith.constant dense<0.000000e+00> : vector<8x128xf32>
    %51 = tpu.matmul %49, %50, %cst_49 {dimension_numbers = #tpu.dot_dimension_numbers<[1], [0], [0], [1], [0, 0, 1, 1], [], []>} : vector<8x128xf32>, vector<128x128xf32>, vector<8x128xf32> -> vector<8x128xf32>
    %c0_50 = arith.constant 0 : index
    %c0_51 = arith.constant 0 : index
    %52 = vector.load %arg10[%c0_50, %c0_51] : memref<1x128xf32, #tpu.memory_space<vmem>>, vector<1x128xf32>
    %53 = vector.broadcast %52 : vector<1x128xf32> to vector<8x128xf32>
    %54 = arith.addf %51, %53 : vector<8x128xf32>
    %55 = vector.extract_strided_slice %54 {offsets = [0, 0], sizes = [8, 32], strides = [1, 1]} : vector<8x128xf32> to vector<8x32xf32>
    %c0_52 = arith.constant 0 : index
    %c0_53 = arith.constant 0 : index
    %c0_54 = arith.constant 0 : index
    %c0_55 = arith.constant 0 : index
    %56 = vector.load %arg13[%c0_52, %c0_53, %c0_54, %c0_55] : memref<1x4x8x32xf32, #tpu.memory_space<vmem>>, vector<1x1x8x32xf32>
    %57 = vector.shape_cast %56 : vector<1x1x8x32xf32> to vector<8x32xf32>
    %58 = vector.shape_cast %55 : vector<8x32xf32> to vector<1x1x8x32xf32>
    tpu.vector_store %arg13[%c0_52, %c0_53, %c0_54, %c0_55], %58 {strides = array<i32>} : memref<1x4x8x32xf32, #tpu.memory_space<vmem>>, vector<1x1x8x32xf32>,
    %59 = vector.extract_strided_slice %54 {offsets = [0, 32], sizes = [8, 32], strides = [1, 1]} : vector<8x128xf32> to vector<8x32xf32>
    %c0_56 = arith.constant 0 : index
    %c1_57 = arith.constant 1 : index
    %c0_58 = arith.constant 0 : index
    %c0_59 = arith.constant 0 : index
    %60 = vector.load %arg13[%c0_56, %c1_57, %c0_58, %c0_59] : memref<1x4x8x32xf32, #tpu.memory_space<vmem>>, vector<1x1x8x32xf32>
    %61 = vector.shape_cast %60 : vector<1x1x8x32xf32> to vector<8x32xf32>
    %62 = vector.shape_cast %59 : vector<8x32xf32> to vector<1x1x8x32xf32>
    tpu.vector_store %arg13[%c0_56, %c1_57, %c0_58, %c0_59], %62 {strides = array<i32>} : memref<1x4x8x32xf32, #tpu.memory_space<vmem>>, vector<1x1x8x32xf32>,
    %63 = vector.extract_strided_slice %54 {offsets = [0, 64], sizes = [8, 32], strides = [1, 1]} : vector<8x128xf32> to vector<8x32xf32>
    %c0_60 = arith.constant 0 : index
    %c2_61 = arith.constant 2 : index
    %c0_62 = arith.constant 0 : index
    %c0_63 = arith.constant 0 : index
    %64 = vector.load %arg13[%c0_60, %c2_61, %c0_62, %c0_63] : memref<1x4x8x32xf32, #tpu.memory_space<vmem>>, vector<1x1x8x32xf32>
    %65 = vector.shape_cast %64 : vector<1x1x8x32xf32> to vector<8x32xf32>
    %66 = vector.shape_cast %63 : vector<8x32xf32> to vector<1x1x8x32xf32>
    tpu.vector_store %arg13[%c0_60, %c2_61, %c0_62, %c0_63], %66 {strides = array<i32>} : memref<1x4x8x32xf32, #tpu.memory_space<vmem>>, vector<1x1x8x32xf32>,
    %67 = vector.extract_strided_slice %54 {offsets = [0, 96], sizes = [8, 32], strides = [1, 1]} : vector<8x128xf32> to vector<8x32xf32>
    %c0_64 = arith.constant 0 : index
    %c3_65 = arith.constant 3 : index
    %c0_66 = arith.constant 0 : index
    %c0_67 = arith.constant 0 : index
    %68 = vector.load %arg13[%c0_64, %c3_65, %c0_66, %c0_67] : memref<1x4x8x32xf32, #tpu.memory_space<vmem>>, vector<1x1x8x32xf32>
    %69 = vector.shape_cast %68 : vector<1x1x8x32xf32> to vector<8x32xf32>
    %70 = vector.shape_cast %67 : vector<8x32xf32> to vector<1x1x8x32xf32>
    tpu.vector_store %arg13[%c0_64, %c3_65, %c0_66, %c0_67], %70 {strides = array<i32>} : memref<1x4x8x32xf32, #tpu.memory_space<vmem>>, vector<1x1x8x32xf32>,
    return
  }
  func.func @transform_0(%arg0: i32, %arg1: i32) -> (i32, i32, i32) {
    %c0_i32 = arith.constant 0 : i32
    %c0_i32_0 = arith.constant 0 : i32
    return %arg0, %arg1, %c0_i32 : i32, i32, i32
  }
  func.func @transform_1(%arg0: i32, %arg1: i32) -> (i32, i32, i32) {
    %c0_i32 = arith.constant 0 : i32
    %c0_i32_0 = arith.constant 0 : i32
    return %arg0, %arg1, %c0_i32 : i32, i32, i32
  }
  func.func @transform_2(%arg0: i32, %arg1: i32) -> (i32, i32, i32) {
    %c0_i32 = arith.constant 0 : i32
    %c0_i32_0 = arith.constant 0 : i32
    return %arg0, %arg1, %c0_i32 : i32, i32, i32
  }
  func.func @transform_3(%arg0: i32, %arg1: i32) -> (i32, i32) {
    %c0_i32 = arith.constant 0 : i32
    %c0_i32_0 = arith.constant 0 : i32
    %c0_i32_1 = arith.constant 0 : i32
    return %c0_i32, %c0_i32_0 : i32, i32
  }
  func.func @transform_4(%arg0: i32, %arg1: i32) -> (i32, i32) {
    %c0_i32 = arith.constant 0 : i32
    %c0_i32_0 = arith.constant 0 : i32
    %c0_i32_1 = arith.constant 0 : i32
    return %c0_i32, %c0_i32_0 : i32, i32
  }
  func.func @transform_5(%arg0: i32, %arg1: i32) -> (i32, i32) {
    %c0_i32 = arith.constant 0 : i32
    %c0_i32_0 = arith.constant 0 : i32
    %c0_i32_1 = arith.constant 0 : i32
    return %c0_i32, %c0_i32_0 : i32, i32
  }
  func.func @transform_6(%arg0: i32, %arg1: i32) -> (i32, i32) {
    %c0_i32 = arith.constant 0 : i32
    %c0_i32_0 = arith.constant 0 : i32
    %c0_i32_1 = arith.constant 0 : i32
    return %c0_i32, %c0_i32_0 : i32, i32
  }
  func.func @transform_7(%arg0: i32, %arg1: i32) -> (i32, i32) {
    %c0_i32 = arith.constant 0 : i32
    %c0_i32_0 = arith.constant 0 : i32
    %c0_i32_1 = arith.constant 0 : i32
    return %c0_i32, %c0_i32_0 : i32, i32
  }
  func.func @transform_8(%arg0: i32, %arg1: i32) -> (i32, i32) {
    %c0_i32 = arith.constant 0 : i32
    %c0_i32_0 = arith.constant 0 : i32
    %c0_i32_1 = arith.constant 0 : i32
    return %c0_i32, %c0_i32_0 : i32, i32
  }
  func.func @transform_9(%arg0: i32, %arg1: i32) -> (i32, i32, i32, i32) {
    %c0_i32 = arith.constant 0 : i32
    %c0_i32_0 = arith.constant 0 : i32
    %c0_i32_1 = arith.constant 0 : i32
    return %arg0, %c0_i32, %arg1, %c0_i32_0 : i32, i32, i32, i32
  }
  func.func @transform_10(%arg0: i32, %arg1: i32) -> (i32, i32, i32, i32) {
    %c0_i32 = arith.constant 0 : i32
    %c0_i32_0 = arith.constant 0 : i32
    %c0_i32_1 = arith.constant 0 : i32
    return %arg0, %c0_i32, %arg1, %c0_i32_0 : i32, i32, i32, i32
  }
  func.func @transform_11(%arg0: i32, %arg1: i32) -> (i32, i32, i32, i32) {
    %c0_i32 = arith.constant 0 : i32
    %c0_i32_0 = arith.constant 0 : i32
    %c0_i32_1 = arith.constant 0 : i32
    return %arg0, %c0_i32, %arg1, %c0_i32_0 : i32, i32, i32, i32
  }
}

</mosaic_0001>

<bundles_post_ra>
// kernel: tpu_custom_call.1
= control target key start
LH: loop header
LB: loop body
LE: loop exit
PB: predicated region body
PF: predicated region fallthrough
CT: control target
= control target key end

     0   :  { %s2328_s0 = inlined_call_operand.hbm [shape: f32[2,8,128], index: 0, kind: input, shape index: {}]   ;;  %s2329_s1 = inlined_call_operand.hbm [shape: f32[2,8,128], index: 1, kind: input, shape index: {}]   ;;  %s2330_s2 = inlined_call_operand.hbm [shape: f32[2,8,128], index: 2, kind: input, shape index: {}]   ;;  %s2331_s3 = inlined_call_operand.hbm [shape: f32[128,128], index: 3, kind: input, shape index: {}]   ;;  %s2332_s4 = inlined_call_operand.vmem [shape: f32[1,128], index: 4, kind: input, shape index: {}]   ;;  %s2333_s5 = inlined_call_operand.hbm [shape: f32[128,128], index: 5, kind: input, shape index: {}]   ;;  %s2334_s6 = inlined_call_operand.vmem [shape: f32[1,128], index: 6, kind: input, shape index: {}]   ;;  %s2335_s7 = inlined_call_operand.hbm [shape: f32[128,128], index: 7, kind: input, shape index: {}]   ;;  %s2336_s8 = inlined_call_operand.vmem [shape: f32[1,128], index: 8, kind: input, shape index: {}]   ;;  %s2337_s9 = inlined_call_operand.hbm [shape: f32[2,4,8,32], index: 9, kind: output, shape index: {0}]   ;;  %s2338_s10 = inlined_call_operand.hbm [shape: f32[2,4,8,32], index: 10, kind: output, shape index: {1}]   ;;  %s2339_s11 = inlined_call_operand.hbm [shape: f32[2,4,8,32], index: 11, kind: output, shape index: {2}]  }
   0x1   :  { %2361 = sst [smem:[#allocation29_spill]] %s2329_s1 }
   0x2   :  { %2362 = sst [smem:[#allocation30_spill]] %s2331_s3 }
   0x3   :  { %2363 = sst [smem:[#allocation31_spill]] %s2333_s5 }
   0x4   :  { %2364 = sst [smem:[#allocation32_spill]] %s2337_s9 }
   0x5   :  { %2365 = sst [smem:[#allocation33_spill]] %s2338_s10 }
   0x6   :  { %2366 = sst [smem:[#allocation34_spill]] %s2339_s11 }
   0x7   :  { %17 = vsyncpa [#allocation3], 0 }
   0x8   :  { %19 = vsyncpa [#allocation3 + $0x1], 0 }
   0x9   :  { %20 = vsyncpa [#allocation6], 0 }
   0xa   :  { %22 = vsyncpa [#allocation6 + $0x1], 0 }
   0xb   :  { %23 = vsyncpa [#allocation9], 0 }
   0xc   :  { %24 = vsyncpa [#allocation12], 0 }
   0xd   :  { %25 = vsyncpa [#allocation4], 0 }
   0xe   :  { %27 = vsyncpa [#allocation4 + $0x1], 0 }
   0xf   :  { %28 = vsyncpa [#allocation15], 0 }
  0x10   :  { %30 = vsyncpa [#allocation15 + $0x1], 0  ;;  %s1896_s17 = smov 0   ;;  %s1898_s18 = smov 0  }
  0x11   :  { %s1900_s19 = smov 0   ;;  %s1902_s20 = smov 0  }
  0x12   :  { %s1904_s21 = smov 0   ;;  %s1906_s22 = smov 0  }
  0x13 LB: > { %2367 = sst [smem:[#allocation23_spill]] %s1796_s17  ;;  %s1927_s23 = sadd.s32 4294967295, %s1816_s22   ;;  %s1816_s22 = sphi %s1906_s22, %s36_s22   ;;  %s1812_s21 = sphi %s1904_s21, %s2408_s21   ;;  %s1808_s20 = sphi %s1902_s20, %s2412_s20   ;;  %s1804_s19 = sphi %s1900_s19, %s2411_s19   ;;  %s1800_s18 = sphi %s1898_s18, %s2410_s18   ;;  %s1796_s17 = sphi %s1896_s17, %s2409_s17  }
  0x14   : > { %2368 = sst [smem:[#allocation24_spill]] %s1812_s21  ;;  %s2340_s24 = sadd.s32 4294967294, %s1816_s22  }
  0x15   : > { %2369 = sst [smem:[#allocation25_spill]] %s1816_s22  ;;  %p70_p0 = scmp.ne.s32.totalorder %s1800_s18, %s1796_s17 }
  0x16   : > { %p2355_p1 = scmp.eq.s32.totalorder %s1927_s23, 0  ;;  %p284_p3 = scmp.eq.s32.totalorder %s2340_s24, 1 }
  0x17   : > { %p1181_p5 = scmp.ge.s32.totalorder %s1816_s22, 1  ;;  %p347_p7 = scmp.lt.s32.totalorder %s1816_s22, 3 }
  0x18   : > { %p1938_p4 = por %p2355_p1, %p70_p0  ;;  %p1943_p6 = por %p284_p3, %p70_p0 }
  0x19   : > { %p1948_p8 = pnand %p1181_p5, %p347_p7  ;;  %s1818_s28 = smov [#allocation8]  }
  0x1a   : > { %s2370_s25 = scalar_select %p1938_p4, 1, 0 }
  0x1b   : > { %s2371_s26 = scalar_select %p1943_p6, 1, 0 }
  0x1c   : > { %s2373_s27 = scalar_select %p1948_p8, 1, 0 }
  0x1d   : > { %2372 = sst [smem:[#allocation26_spill]] %s2371_s26  ;;  %s359_s29 = sshll.u32 %s1818_s28, 4  ;;  %s360_s29 = int_to_ptr.vmem [resolvable:$true] %s359_s29 }
  0x1e   : > { %p1408_p9 = pneg %p1948_p8  ;;  %s48_s12 = sadd.s32 1, %s1812_s21 }
  0x1f   : > { %s1517_s13 = scalar_lea.vmem %s360_s29, 2048  ;;  %p1525_p5 = scmp.lt.s32.totalorder %s360_s29, %s360_s29 }
  0x20   : > { %p1957_p11 = pnand %p1408_p9, %p2355_p1  ;;  %p1518_p13 = scmp.ne.s32.totalorder %s360_s29, %s1517_s13 }
  0x21   : > { %p1526_p7 = scmp.lt.s32.totalorder %s1517_s13, %s1517_s13 }
  0x22   : > { %p2356_p12 = pneg %p1957_p11 }
  0x23   : > { %p1527_p2 = por %p1526_p7, %p1525_p5 }
  0x24   : > { %p1520_p0 = pnand %p1518_p13, %p2356_p12 }
  0x26   : > { %p1521_p3 = pneg %p1520_p0 }
  0x28   : > { %p1528_p10 = pnand %p1527_p2, %p1521_p3 }
  0x2a   : > { %1531 = shalt.err (!%p1528_p10)
}
  0x2b   : > { %s2343_s14 = smov 128   ;;  %s2345_s15 = smov 8  }
  0x2c   : > { %s2375_s3 = sld [smem:[#allocation30_spill]]  ;;  %p50_p2 = scmp.ge.s32.totalorder %s48_s12, 2 }
  0x2d   : > { %s57_s13 = sadd.s32 1, %s1804_s19  ;;  %p64_p9 = scmp.ne.s32.totalorder %s1804_s19, %s1800_s18 }
  0x2e   : > { %p65_p10 = scmp.eq.s32.totalorder %s1816_s22, 0  ;;  %s2414_s12 = smov (%p50_p2, %s48_s12), 0 }
  0x2f   : > { %2376 = sst [smem:[#allocation27_spill]] %s2414_s12  ;;  %p2377_p0 = scmp.eq.s32.totalorder %s1927_s23, 1 }
  0x30   : > { %p66_p13 = por %p65_p10, %p64_p9  ;;  %s52_s26 = ssub.s32 %s1812_s21, %s2414_s12 }
  0x31   : > { %p1983_p3 = por %p2377_p0, %p64_p9  ;;  %p1441_p5 = scmp.lt.s32.totalorder %s1816_s22, 2 }
  0x32   : > { %1411 = dma.hbm_to_vmem [thread:$0]  (!%p1957_p11), %s2375_s3, 2048, %s360_s29, [#allocation9], %s2343_s14, %s2343_s14, %s2345_s15  }
  0x33   : > { %s2378_s24 = scalar_select %p1983_p3, 1, 0 }
  0x34   : > { %p55_p7 = scmp.eq.s32.totalorder %s52_s26, 0  ;;  %s2349_s17 = sand.u32 1, %s1804_s19  }
  0x35   : > { %s1993_s29 = sshll.u32 %s2349_s17, 3  ;;  %s1996_s16 = sshll.u32 %s1812_s21, 7 }
  0x36   : > { %s1999_s28 = scalar_select %p55_p7, %s1804_s19, %s57_s13  }
  0x37   : > { %p2001_p2 = pnand %p1441_p5, %p66_p13  ;;  %s427_s15 = sand.u32 1, %s1816_s22  }
  0x38   : > { %2379 = sst [smem:[#allocation28_spill]] %s1999_s28  ;;  %s431_s11 = scalar_lea.vmem [#allocation5], %s1993_s29 }
  0x39   : > { %s2381_s1 = sld [smem:[#allocation29_spill]]  ;;  %s439_s17 = sshll.u32 %s431_s11, 4  ;;  %s440_s17 = int_to_ptr.vmem [resolvable:$true] %s439_s17 }
  0x3a   : > { %s1821_s9 = smov [#allocation10]   ;;  %s2011_s10 = scalar_lea.sflag [#allocation6], %s427_s15 }
  0x3b   : > { %s375_s21 = sshll.u32 %s1821_s9, 4  ;;  %p2357_p9 = pneg %p2001_p2  ;;  %s376_s21 = int_to_ptr.vmem [resolvable:$true] %s375_s21 }
  0x3c   : > { %s1545_s13 = scalar_lea.vmem %s440_s17, 128  ;;  %s1822_s28 = smov [#allocation5]  }
  0x3d   : > { %p1546_p10 = scmp.ne.s32.totalorder %s440_s17, %s1545_s13  ;;  %s1550_s22 = sshll.u32 %s1822_s28, 4  ;;  %s1551_s22 = int_to_ptr.vmem [resolvable:$false] %s1550_s22 }
  0x3e   : > { %s1552_s3 = scalar_lea.vmem %s1551_s22, 256  ;;  %p1553_p5 = scmp.lt.s32.totalorder %s440_s17, %s1551_s22 }
  0x3f   : > { %s437_s26 = scalar_lea.hbm %s2381_s1, %s1996_s16  ;;  %p1548_p13 = pnand %p1546_p10, %p2357_p9 }
  0x40   : > { %p1554_p7 = scmp.lt.s32.totalorder %s1552_s3, %s1545_s13 }
  0x41   : > { %p1549_p0 = pneg %p1548_p13 }
  0x42   : > { %p1555_p1 = por %p1554_p7, %p1553_p5 }
  0x44   : > { %p1556_p12 = pnand %p1555_p1, %p1549_p0 }
  0x46   : > { %1559 = shalt.err (!%p1556_p12)
}
  0x47   : > { %1424 = dma.hbm_to_vmem [thread:$0]  (!%p2001_p2), %s437_s26, 128, %s440_s17, %s2011_s10  }
  0x48   : > { %s1571_s9 = scalar_lea.vmem %s376_s21, 2048  ;;  %p2382_p10 = pneg %p1957_p11 }
  0x49   : > { %p1572_p6 = scmp.ne.s32.totalorder %s376_s21, %s1571_s9  ;;  %p1579_p3 = scmp.lt.s32.totalorder %s376_s21, %s376_s21 }
  0x4a   : > { %p1580_p4 = scmp.lt.s32.totalorder %s1571_s9, %s1571_s9 }
  0x4b   : > { %p1574_p13 = pnand %p1572_p6, %p2382_p10 }
  0x4c   : > { %p1581_p8 = por %p1580_p4, %p1579_p3 }
  0x4d   : > { %p1575_p9 = pneg %p1574_p13 }
  0x4f   : > { %p1582_p5 = pnand %p1581_p8, %p1575_p9 }
  0x51   : > { %1585 = shalt.err (!%p1582_p5)
}
  0x52   : > { %s2383_s11 = smov 8   ;;  %s2384_s22 = smov 128  }
  0x53   : > { %s2385_s5 = sld [smem:[#allocation31_spill]]  ;;  %s1823_s17 = smov [#allocation11]  }
  0x54   : > { %s391_s28 = sshll.u32 %s1823_s17, 4  ;;  %p2386_p6 = pmov %p2382_p10  ;;  %s392_s28 = int_to_ptr.vmem [resolvable:$true] %s391_s28 }
  0x55   : > { %s1597_s26 = scalar_lea.vmem %s392_s28, 2048  ;;  %p1605_p12 = scmp.lt.s32.totalorder %s392_s28, %s392_s28 }
  0x56   : > { %p1598_p1 = scmp.ne.s32.totalorder %s392_s28, %s1597_s26  ;;  %p1606_p3 = scmp.lt.s32.totalorder %s1597_s26, %s1597_s26 }
  0x58   : > { %p1600_p4 = pnand %p1598_p1, %p2386_p6  ;;  %p1607_p9 = por %p1606_p3, %p1605_p12 }
  0x59   : > { %1414 = dma.hbm_to_vmem [thread:$0]  (!%p1957_p11), %s2385_s5, 2048, %s376_s21, [#allocation9], %s2384_s22, %s2384_s22, %s2383_s11  }
  0x5a   : > { %p1601_p8 = pneg %p1600_p4 }
  0x5c   : > { %p1608_p0 = pnand %p1607_p9, %p1601_p8 }
  0x5e   : > { %1611 = shalt.err (!%p1608_p0)
}
  0x5f   : > { %1417 = dma.hbm_to_vmem [thread:$0]  (!%p1957_p11), %s2335_s7, 2048, %s392_s28, [#allocation12], %s2384_s22, %s2384_s22, %s2383_s11  }
  0x60   : > { %s418_s12 = scalar_lea.hbm %s2328_s0, %s1996_s16  ;;  %s412_s15 = scalar_lea.vmem [#allocation2], %s1993_s29 }
  0x61   : > { %s420_s17 = sshll.u32 %s412_s15, 4  ;;  %s2387_s26 = sand.u32 1, %s1804_s19   ;;  %s421_s17 = int_to_ptr.vmem [resolvable:$true] %s420_s17 }
  0x62   : > { %s409_s30 = scalar_lea.sflag [#allocation3], %s2387_s26  ;;  %s1625_s1 = scalar_lea.vmem %s421_s17, 128 }
  0x63   : > { %p1626_p7 = scmp.ne.s32.totalorder %s421_s17, %s1625_s1  ;;  %p2388_p10 = pneg %p2001_p2 }
  0x64   : > { %s1824_s21 = smov [#allocation2]  }
  0x65   : > { %p1628_p13 = pnand %p1626_p7, %p2388_p10  ;;  %s1630_s13 = sshll.u32 %s1824_s21, 4  ;;  %s1631_s13 = int_to_ptr.vmem [resolvable:$false] %s1630_s13 }
  0x66   : > { %s1632_s5 = scalar_lea.vmem %s1631_s13, 256  ;;  %p1633_p11 = scmp.lt.s32.totalorder %s421_s17, %s1631_s13 }
  0x67   : > { %p1629_p5 = pneg %p1628_p13  ;;  %p1634_p1 = scmp.lt.s32.totalorder %s1632_s5, %s1625_s1 }
  0x69   : > { %p1635_p6 = por %p1634_p1, %p1633_p11 }
  0x6b   : > { %p1636_p4 = pnand %p1635_p6, %p1629_p5 }
  0x6d   : > { %1639 = shalt.err (!%p1636_p4)
}
  0x6e   : > { %1421 = dma.hbm_to_vmem [thread:$0]  (!%p2001_p2), %s418_s12, 128, %s421_s17, %s409_s30  }
  0x6f   : > { %s456_s28 = scalar_lea.hbm %s2330_s2, %s1996_s16  ;;  %s450_s3 = scalar_lea.vmem [#allocation7], %s1993_s29 }
  0x70   : > { %s458_s9 = sshll.u32 %s450_s3, 4  ;;  %p2389_p12 = pmov %p2388_p10  ;;  %s459_s9 = int_to_ptr.vmem [resolvable:$true] %s458_s9 }
  0x71   : > { %s1653_s15 = scalar_lea.vmem %s459_s9, 128  ;;  %s1825_s1 = smov [#allocation7]  }
  0x72   : > { %p1654_p8 = scmp.ne.s32.totalorder %s459_s9, %s1653_s15  ;;  %s1658_s5 = sshll.u32 %s1825_s1, 4  ;;  %s1659_s5 = int_to_ptr.vmem [resolvable:$false] %s1658_s5 }
  0x73   : > { %s1660_s26 = scalar_lea.vmem %s1659_s5, 256  ;;  %p1661_p0 = scmp.lt.s32.totalorder %s459_s9, %s1659_s5 }
  0x74   : > { %p1656_p3 = pnand %p1654_p8, %p2389_p12  ;;  %p1662_p7 = scmp.lt.s32.totalorder %s1660_s26, %s1653_s15 }
  0x76   : > { %p1657_p9 = pneg %p1656_p3  ;;  %p1663_p10 = por %p1662_p7, %p1661_p0 }
  0x78   : > { %p1664_p13 = pnand %p1663_p10, %p1657_p9 }
  0x7a   : > { %1667 = shalt.err (!%p1664_p13)
}
  0x7b   : > { %1427 = dma.hbm_to_vmem [thread:$0]  (!%p2001_p2), %s456_s28, 128, %s459_s9, %s2011_s10  }
  0x7c   : > { %p2390_p5 = scmp.ne.s32.totalorder %s2373_s27, 0 }
  0x7d   : > { %s2069_s29 = sand.u32 (!%p2390_p5), 1, %s1800_s18   ;;  %p2391_p11 = scmp.ne.s32.totalorder (!%p2390_p5), %s2370_s25, 0 }
  0x7e   : > { %467 = sbr.rel (%p2390_p5) target bundleno = 550 (0x226), region = 56  ;;  %s2072_s16 = sshll.u32 (!%p2390_p5), %s2069_s29, 3 }
  0x7f   : > { %s470_s12 = scalar_lea.sflag (!%p2390_p5), [#allocation3], %s2069_s29  ;;  %s473_s17 = scalar_lea.vmem (!%p2390_p5), [#allocation2], %s2072_s16 }
  0x83   : > { %1771 = dma.done.wait (%p2391_p11), %s470_s12, 128  }
  0x84   : > { %1773 = vsyncadd (%p2391_p11), %s470_s12, 4294967168  ;;  %s478_s10 = sand.u32 1, %s1927_s23   ;;  %s482_s14 = scalar_lea.vmem [#allocation5], %s2072_s16 }
  0x85   : > { %s479_s27 = scalar_lea.sflag [#allocation6], %s478_s10 }
  0x86   : > { %1775 = dma.done.wait (%p2391_p11), %s479_s27, 256  }
  0x87   : > { %1777 = vsyncadd (%p2391_p11), %s479_s27, 4294967040  ;;  %s491_s30 = scalar_lea.vmem [#allocation7], %s2072_s16  ;;  %p2392_p2 = scmp.eq.s32.totalorder %s1927_s23, 0 }
  0x89   : > { %1779 = dma.done.wait (%p2392_p2), [#allocation9], 4096   ;;  %p2393_p1 = pmov %p2392_p2 }
  0x8b   : > { %1781 = vsyncadd (%p2393_p1), [#allocation9], 4294963200  ;;  %p2394_p6 = pmov %p2393_p1 }
  0x8c   : > { %p2395_p4 = pmov %p2393_p1 }
  0x8d   : > { %1783 = dma.done.wait (%p2394_p6), [#allocation12], 2048  }
  0x8e   : > { %1785 = vsyncadd (%p2395_p4), [#allocation12], 4294965248  ;;  %v1826_v0 = vmov 0.0   ;;  %vm1827_vm0 = vmmov 0   ;;  %v578_v1 = vld [vmem:[#allocation8 + $0x78] sm:$0xff]  ;;  %v577_v3 = vld [vmem:[#allocation8 + $0x70] sm:$0xff] }
  0x8f   : > { %1279 = vmatprep.subr.mxu0 %v1826_v0  ;;  %1314 = vmatprep.subr.mxu1 %v1826_v0  ;;  %v691_v2 = vld [vmem:[#allocation10 + $0x78] sm:$0xff]  ;;  %v690_v4 = vld [vmem:[#allocation10 + $0x70] sm:$0xff]  ;;  %v576_v5 = vld [vmem:[#allocation8 + $0x68] sm:$0xff]  ;;  %s1199_s22 = sshll.u32 %s2069_s29, 5  ;;  %vm657_vm1 = vcmask 261120   ;;  %s1828_s3 = smov 32  }
  0x90   : > { %1311 = vmatprep.mubr.msk.f32.mxu0 %vm1827_vm0, %v1826_v0  ;;  %1346 = vmatprep.mubr.msk.f32.mxu1 %vm1827_vm0, %v1826_v0  ;;  %v689_v6 = vld [vmem:[#allocation10 + $0x68] sm:$0xff]  ;;  %v575_v7 = vld [vmem:[#allocation8 + $0x60] sm:$0xff]  ;;  %v574_v9 = vld [vmem:[#allocation8 + $0x58] sm:$0xff]  ;;  %s2164_s28 = scalar_lea.vmem [#allocation14], %s1199_s22  ;;  %s1829_s9 = smov 96  }
  0x91   : > { %1280 = vmatpush3.msra.mxu0 %v578_v1  ;;  %1315 = vmatpush3.msra.mxu1 %v691_v2  ;;  %v688_v8 = vld [vmem:[#allocation10 + $0x60] sm:$0xff]  ;;  %v687_v10 = vld [vmem:[#allocation10 + $0x58] sm:$0xff]  ;;  %v573_v11 = vld [vmem:[#allocation8 + $0x50] sm:$0xff]  ;;  %s2168_s15 = scalar_lea.vmem [#allocation13], %s1199_s22  ;;  %s1830_s1 = smov 64  }
  0x92   : > { %1281 = vmatprep.subr.mxu0 %v1826_v0  ;;  %1316 = vmatprep.subr.mxu1 %v1826_v0  ;;  %v686_v12 = vld [vmem:[#allocation10 + $0x50] sm:$0xff]  ;;  %v572_v13 = vld [vmem:[#allocation8 + $0x48] sm:$0xff]  ;;  %v571_v15 = vld [vmem:[#allocation8 + $0x40] sm:$0xff]  ;;  %s2175_s16 = scalar_lea.vmem [#allocation16], %s1199_s22  ;;  %s939_s12 = sshll.u32 %s2164_s28, 4  ;;  %s2184_s12 = int_to_ptr.vmem [resolvable:$true] %s939_s12 }
  0x93   : > { %1282 = vmatpush3.msra.mxu0 %v577_v3  ;;  %1317 = vmatpush3.msra.mxu1 %v690_v4  ;;  %v685_v14 = vld [vmem:[#allocation10 + $0x48] sm:$0xff]  ;;  %v684_v16 = vld [vmem:[#allocation10 + $0x40] sm:$0xff]  ;;  %v570_v17 = vld [vmem:[#allocation8 + $0x38] sm:$0xff]  ;;  %s922_s27 = sshll.u32 %s2168_s15, 4  ;;  %s2396_s25 = sld [smem:[#allocation33_spill]]  ;;  %s2196_s27 = int_to_ptr.vmem [resolvable:$true] %s922_s27 }
  0x94   : > { %1283 = vmatprep.subr.mxu0 %v1826_v0  ;;  %1318 = vmatprep.subr.mxu1 %v1826_v0  ;;  %v683_v18 = vld [vmem:[#allocation10 + $0x38] sm:$0xff]  ;;  %v569_v19 = vld [vmem:[#allocation8 + $0x30] sm:$0xff]  ;;  %v568_v21 = vld [vmem:[#allocation8 + $0x28] sm:$0xff]  ;;  %s1668_s13 = scalar_lea.vmem %s2184_s12, 512  ;;  %p2397_p12 = scmp.ne.s32.totalorder %s2378_s24, 0 }
  0x95   : > { %1284 = vmatpush3.msra.mxu0 %v576_v5  ;;  %1319 = vmatpush3.msra.mxu1 %v689_v6  ;;  %v682_v20 = vld [vmem:[#allocation10 + $0x30] sm:$0xff]  ;;  %v681_v22 = vld [vmem:[#allocation10 + $0x28] sm:$0xff]  ;;  %v567_v23 = vld [vmem:[#allocation8 + $0x20] sm:$0xff]  ;;  %p1669_p8 = scmp.ne.s32.totalorder %s2184_s12, %s1668_s13  ;;  %s1831_s11 = smov [#allocation14]  }
  0x96   : > { %1285 = vmatprep.subr.mxu0 %v1826_v0  ;;  %1320 = vmatprep.subr.mxu1 %v1826_v0  ;;  %v680_v24 = vld [vmem:[#allocation10 + $0x20] sm:$0xff]  ;;  %v566_v25 = vld [vmem:[#allocation8 + $0x18] sm:$0xff]  ;;  %v565_v27 = vld [vmem:[#allocation8 + $0x10] sm:$0xff]  ;;  %s1672_s22 = sshll.u32 %s1831_s11, 4  ;;  %s1673_s22 = int_to_ptr.vmem [resolvable:$false] %s1672_s22 }
  0x97   : > { %1286 = vmatpush3.msra.mxu0 %v575_v7  ;;  %1321 = vmatpush3.msra.mxu1 %v688_v8  ;;  %v679_v26 = vld [vmem:[#allocation10 + $0x18] sm:$0xff]  ;;  %v678_v28 = vld [vmem:[#allocation10 + $0x10] sm:$0xff]  ;;  %v564_v29 = vld [vmem:[#allocation8 + $0x8] sm:$0xff]  ;;  %p1670_p3 = pnand %p1669_p8, %p2397_p12  ;;  %p1675_p0 = scmp.lt.s32.totalorder %s2184_s12, %s1673_s22 }
  0x98   : > { %1287 = vmatprep.subr.mxu0 %v1826_v0  ;;  %1322 = vmatprep.subr.mxu1 %v1826_v0  ;;  %v677_v30 = vld [vmem:[#allocation10 + $0x8] sm:$0xff]  ;;  %v563_v31 = vld [vmem:[#allocation8] sm:$0xff]  ;;  %v562_v33 = vld [vmem:[%s473_s17] sm:$0xff]  ;;  %s2181_s17 = sshll.u32 %s1808_s20, 9  ;;  %s2204_s20 = scalar_lea.sflag [#allocation15], %s478_s10 }
  0x99   : > { %1288 = vmatpush3.msra.mxu0 %v574_v9  ;;  %1323 = vmatpush3.msra.mxu1 %v687_v10  ;;  %v676_v32 = vld [vmem:[#allocation10] sm:$0xff]  ;;  %v802_v35 = vld [vmem:[#allocation11 + $0x78] sm:$0xff]  ;;  %v801_v36 = vld [vmem:[#allocation11 + $0x70] sm:$0xff]  ;;  %s2194_s21 = scalar_lea.hbm %s2396_s25, %s2181_s17  ;;  %p1671_p9 = pneg %p1670_p3 }
  0x9a   : > { %1289 = vmatprep.subr.mxu0 %v1826_v0  ;;  %1324 = vmatprep.subr.mxu1 %v1826_v0  ;;  %v675_v34 = vld [vmem:[%s482_s14] sm:$0xff]  ;;  %v798_v39 = vld [vmem:[#allocation11 + $0x58] sm:$0xff]  ;;  %v797_v40 = vld [vmem:[#allocation11 + $0x50] sm:$0xff] }
  0x9b   : > { %1290 = vmatpush3.msra.mxu0 %v573_v11  ;;  %1325 = vmatpush3.msra.mxu1 %v686_v12  ;;  %v800_v37 = vld [vmem:[#allocation11 + $0x68] sm:$0xff]  ;;  %v799_v38 = vld [vmem:[#allocation11 + $0x60] sm:$0xff]  ;;  %v794_v43 = vld [vmem:[#allocation11 + $0x38] sm:$0xff] }
  0x9c   : > { %1291 = vmatprep.subr.mxu0 %v1826_v0  ;;  %1326 = vmatprep.subr.mxu1 %v1826_v0  ;;  %v796_v41 = vld [vmem:[#allocation11 + $0x48] sm:$0xff]  ;;  %v795_v42 = vld [vmem:[#allocation11 + $0x40] sm:$0xff]  ;;  %v793_v44 = vld [vmem:[#allocation11 + $0x30] sm:$0xff] }
  0x9d   : > { %1292 = vmatpush3.msra.mxu0 %v572_v13  ;;  %1327 = vmatpush3.msra.mxu1 %v685_v14  ;;  %v792_v45 = vld [vmem:[#allocation11 + $0x28] sm:$0xff]  ;;  %v791_v46 = vld [vmem:[#allocation11 + $0x20] sm:$0xff]  ;;  %v790_v47 = vld [vmem:[#allocation11 + $0x18] sm:$0xff] }
  0x9e   : > { %1293 = vmatprep.subr.mxu0 %v1826_v0  ;;  %1328 = vmatprep.subr.mxu1 %v1826_v0  ;;  %v789_v48 = vld [vmem:[#allocation11 + $0x10] sm:$0xff]  ;;  %v788_v49 = vld [vmem:[#allocation11 + $0x8] sm:$0xff]  ;;  %v787_v50 = vld [vmem:[#allocation11] sm:$0xff] }
  0x9f   : > { %1294 = vmatpush3.msra.mxu0 %v571_v15  ;;  %1329 = vmatpush3.msra.mxu1 %v684_v16  ;;  %v786_v51 = vld [vmem:[%s491_s30] sm:$0xff] }
  0xa0   : > { %1295 = vmatprep.subr.mxu0 %v1826_v0  ;;  %1330 = vmatprep.subr.mxu1 %v1826_v0  ;;  %v1202_v52 = vld [vmem:[%s2332_s4] ss:$0 sm:$0xff] }
  0xa1   : > { %1296 = vmatpush3.msra.mxu0 %v570_v17  ;;  %1331 = vmatpush3.msra.mxu1 %v683_v18  ;;  %v1206_v53 = vld [vmem:[%s2334_s6] ss:$0 sm:$0xff] }
  0xa2   : > { %1297 = vmatprep.subr.mxu0 %v1826_v0  ;;  %1332 = vmatprep.subr.mxu1 %v1826_v0  ;;  %v1210_v61 = vld [vmem:[%s2336_s8] ss:$0 sm:$0xff] }
  0xa3   : > { %1298 = vmatpush3.msra.mxu0 %v569_v19  ;;  %1333 = vmatpush3.msra.mxu1 %v682_v20 }
  0xa4   : > { %1299 = vmatprep.subr.mxu0 %v1826_v0  ;;  %1334 = vmatprep.subr.mxu1 %v1826_v0 }
  0xa5   : > { %1300 = vmatpush3.msra.mxu0 %v568_v21  ;;  %1335 = vmatpush3.msra.mxu1 %v681_v22 }
  0xa6   : > { %1301 = vmatprep.subr.mxu0 %v1826_v0  ;;  %1336 = vmatprep.subr.mxu1 %v1826_v0 }
  0xa7   : > { %1302 = vmatpush3.msra.mxu0 %v567_v23  ;;  %1337 = vmatpush3.msra.mxu1 %v680_v24 }
  0xa8   : > { %1303 = vmatprep.subr.mxu0 %v1826_v0  ;;  %1338 = vmatprep.subr.mxu1 %v1826_v0 }
  0xa9   : > { %1304 = vmatpush3.msra.mxu0 %v566_v25  ;;  %1339 = vmatpush3.msra.mxu1 %v679_v26 }
  0xaa   : > { %1305 = vmatprep.subr.mxu0 %v1826_v0  ;;  %1340 = vmatprep.subr.mxu1 %v1826_v0 }
  0xab   : > { %1306 = vmatpush3.msra.mxu0 %v565_v27  ;;  %1341 = vmatpush3.msra.mxu1 %v678_v28 }
  0xac   : > { %1307 = vmatprep.subr.mxu0 %v1826_v0  ;;  %1342 = vmatprep.subr.mxu1 %v1826_v0 }
  0xad   : > { %1308 = vmatpush3.msra.mxu0 %v564_v29  ;;  %1343 = vmatpush3.msra.mxu1 %v677_v30 }
  0xae   : > { %1309 = vmatprep.subr.mxu0 %v1826_v0  ;;  %1344 = vmatprep.subr.mxu1 %v1826_v0 }
  0xaf   : > { %1310 = vmatpush3.msra.mxu0 %v563_v31  ;;  %1345 = vmatpush3.msra.mxu1 %v676_v32 }
  0xb0   : > { %1312 = vmatmul.mubr.f32.vlgmr.msra.gmra.mxu0 %v562_v33  ;;  %1347 = vmatmul.mubr.f32.vlgmr.msra.gmra.mxu1 %v675_v34 }
  0xb1   : > { %1349 = vmatprep.subr.mxu0 %v1826_v0  ;;  %1381 = vmatprep.mubr.msk.f32.mxu0 %vm1827_vm0, %v1826_v0 }
  0xb2   : > { %1350 = vmatpush3.msra.mxu0 %v802_v35 }
  0xb3   : > { %1351 = vmatprep.subr.mxu0 %v1826_v0 }
  0xb4   : > { %1352 = vmatpush3.msra.mxu0 %v801_v36 }
  0xb5   : > { %1353 = vmatprep.subr.mxu0 %v1826_v0 }
  0xb6   : > { %1354 = vmatpush3.msra.mxu0 %v800_v37 }
  0xb7   : > { %1355 = vmatprep.subr.mxu0 %v1826_v0 }
  0xb8   : > { %1356 = vmatpush3.msra.mxu0 %v799_v38 }
  0xb9   : > { %1357 = vmatprep.subr.mxu0 %v1826_v0 }
  0xba   : > { %1358 = vmatpush3.msra.mxu0 %v798_v39 }
  0xbb   : > { %1359 = vmatprep.subr.mxu0 %v1826_v0 }
  0xbc   : > { %1360 = vmatpush3.msra.mxu0 %v797_v40 }
  0xbd   : > { %1361 = vmatprep.subr.mxu0 %v1826_v0 }
  0xbe   : > { %1362 = vmatpush3.msra.mxu0 %v796_v41 }
  0xbf   : > { %1363 = vmatprep.subr.mxu0 %v1826_v0 }
  0xc0   : > { %1364 = vmatpush3.msra.mxu0 %v795_v42 }
  0xc1   : > { %1365 = vmatprep.subr.mxu0 %v1826_v0 }
  0xc2   : > { %1366 = vmatpush3.msra.mxu0 %v794_v43 }
  0xc3   : > { %1367 = vmatprep.subr.mxu0 %v1826_v0 }
  0xc4   : > { %1368 = vmatpush3.msra.mxu0 %v793_v44 }
  0xc5   : > { %1369 = vmatprep.subr.mxu0 %v1826_v0 }
  0xc6   : > { %1370 = vmatpush3.msra.mxu0 %v792_v45 }
  0xc7   : > { %1371 = vmatprep.subr.mxu0 %v1826_v0 }
  0xc8   : > { %1372 = vmatpush3.msra.mxu0 %v791_v46 }
  0xc9   : > { %1373 = vmatprep.subr.mxu0 %v1826_v0 }
  0xca   : > { %1374 = vmatpush3.msra.mxu0 %v790_v47 }
  0xcb   : > { %1375 = vmatprep.subr.mxu0 %v1826_v0 }
  0xcc   : > { %1376 = vmatpush3.msra.mxu0 %v789_v48 }
  0xcd   : > { %1377 = vmatprep.subr.mxu0 %v1826_v0 }
  0xce   : > { %1378 = vmatpush3.msra.mxu0 %v788_v49 }
  0xcf   : > { %1379 = vmatprep.subr.mxu0 %v1826_v0 }
  0xd0   : > { %1380 = vmatpush3.msra.mxu0 %v787_v50 }
  0xd1   : > { %1382 = vmatmul.mubr.f32.vlgmr.msra.gmra.mxu0 %v786_v51 }
 0x170   : > { %v652_v54 = vpop.f32.mrf.mxu0  ;;  %v765_v55 = vpop.f32.mrf.mxu1 }
 0x171   : > { %v653_v56 = vadd.f32 %v1202_v52, %v652_v54  ;;  %v766_v57 = vadd.f32 %v1206_v53, %v765_v55 }
 0x172   : > { %v1313_v58 = vpop.f32.mrf.mxu0  ;;  %v1348_v59 = vpop.f32.mrf.mxu1 }
 0x173   : > { %v656_v60 = vmul.f32 0.17677669, %v653_v56  ;;  %769 = vst.msk [vmem:[%s2164_s28] sm:$0xff] %vm657_vm1, %v766_v57  ;;  %781 = vrot.lane.b32.xlu1 %v766_v57, %s1828_s3  ;;  %771 = vrot.lane.b32.xlu0 %v766_v57, %s1829_s9 }
 0x175   : > { %658 = vst.msk [vmem:[%s2168_s15] sm:$0xff] %vm657_vm1, %v656_v60 }
 0x177   : > { %776 = vrot.lane.b32.xlu0 %v766_v57, %s1830_s1  ;;  %660 = vrot.lane.b32.xlu1 %v656_v60, %s1829_s9 }
 0x17b   : > { %665 = vrot.lane.b32.xlu0 %v656_v60, %s1830_s1  ;;  %670 = vrot.lane.b32.xlu1 %v656_v60, %s1828_s3 }
 0x191   : > { %v876_v62 = vpop.f32.mrf.mxu0 }
 0x192   : > { %v877_v63 = vadd.f32 %v1210_v61, %v876_v62 }
 0x193   : > { %v1383_v0 = vpop.f32.mrf.mxu0 }
 0x194   : > { %880 = vst.msk [vmem:[%s2175_s16] sm:$0xff] %vm657_vm1, %v877_v63  ;;  %887 = vrot.lane.b32.xlu1 %v877_v63, %s1830_s1  ;;  %882 = vrot.lane.b32.xlu0 %v877_v63, %s1829_s9 }
 0x198   : > { %892 = vrot.lane.b32.xlu0 %v877_v63, %s1828_s3  ;;  %s1674_s3 = scalar_lea.vmem %s1673_s22, 1024 }
 0x199   : > { %p1676_p7 = scmp.lt.s32.totalorder %s1674_s3, %s1668_s13 }
 0x19b   : > { %p1677_p10 = por %p1676_p7, %p1675_p0 }
 0x19d   : > { %p1678_p13 = pnand %p1677_p10, %p1671_p9 }
 0x1e5   : > { %v782_v1 = vpop.permute.xlu1 %781  ;;  %v772_v2 = vpop.permute.xlu0 %771 }
 0x1e6   : > { %1209 = vst.msk [vmem:[%s2164_s28 + $0x18] sm:$0xff] %vm657_vm1, %v782_v1  ;;  %1207 = vst.msk [vmem:[%s2164_s28 + $0x8] sm:$0xff] %vm657_vm1, %v772_v2 }
 0x1e9   : > { %v777_v3 = vpop.permute.xlu0 %776  ;;  %v661_v4 = vpop.permute.xlu1 %660 }
 0x1ea   : > { %1208 = vst.msk [vmem:[%s2164_s28 + $0x10] sm:$0xff] %vm657_vm1, %v777_v3  ;;  %1203 = vst.msk [vmem:[%s2168_s15 + $0x8] sm:$0xff] %vm657_vm1, %v661_v4 }
 0x1eb   : > { %1681 = shalt.err (!%p1678_p13)
}
 0x1ec   : > { %s1682_s23 = scalar_lea.hbm %s2194_s21, 512  ;;  %s1686_s9 = scalar_lea.hbm %s2396_s25, 1024 }
 0x1ed   : > { %p1683_p5 = scmp.ne.s32.totalorder %s2194_s21, %s1682_s23  ;;  %p1687_p1 = scmp.lt.s32.totalorder %s2194_s21, %s2396_s25 }
 0x1ee   : > { %p1688_p6 = scmp.lt.s32.totalorder %s1686_s9, %s1682_s23 }
 0x1ef   : > { %p1684_p11 = pnand %p1683_p5, %p2397_p12 }
 0x1f0   : > { %p1689_p4 = por %p1688_p6, %p1687_p1 }
 0x1f1   : > { %p1685_p2 = pneg %p1684_p11 }
 0x1f3   : > { %p1690_p8 = pnand %p1689_p4, %p1685_p2 }
 0x1f5   : > { %1693 = shalt.err (!%p1690_p8)
}
 0x1f6   : > { %s1832_s26 = smov 128   ;;  %s1833_s14 = smov 8   ;;  %v666_v5 = vpop.permute.xlu0 %665  ;;  %v671_v6 = vpop.permute.xlu1 %670 }
 0x1f7   : > { %1403 = dma.vmem_to_hbm [thread:$0]  (%p2397_p12), %s2184_s12, 512, %s2194_s21, %s2204_s20, %s1832_s26, %s1832_s26, %s1833_s14  }
 0x1f8   : > { %s2398_s11 = sld [smem:[#allocation32_spill]]  ;;  %1204 = vst.msk [vmem:[%s2168_s15 + $0x10] sm:$0xff] %vm657_vm1, %v666_v5  ;;  %1205 = vst.msk [vmem:[%s2168_s15 + $0x18] sm:$0xff] %vm657_vm1, %v671_v6  ;;  %s898_s3 = scalar_lea.sflag [#allocation4], %s2069_s29 }
 0x1f9   : > { %s1694_s23 = scalar_lea.vmem %s2196_s27, 512  ;;  %s1834_s10 = smov [#allocation13]  }
 0x1fa   : > { %p1695_p3 = scmp.ne.s32.totalorder %s2196_s27, %s1694_s23  ;;  %s1698_s28 = sshll.u32 %s1834_s10, 4  ;;  %s1699_s28 = int_to_ptr.vmem [resolvable:$false] %s1698_s28 }
 0x1fb   : > { %s1700_s12 = scalar_lea.vmem %s1699_s28, 1024  ;;  %p1701_p7 = scmp.lt.s32.totalorder %s2196_s27, %s1699_s28 }
 0x1fc   : > { %p1696_p9 = pnand %p1695_p3, %p2397_p12  ;;  %p1702_p10 = scmp.lt.s32.totalorder %s1700_s12, %s1694_s23 }
 0x1fe   : > { %s2234_s22 = scalar_lea.hbm %s2398_s11, %s2181_s17  ;;  %p1697_p0 = pneg %p1696_p9 }
 0x1ff   : > { %p1703_p13 = por %p1702_p10, %p1701_p7 }
 0x201   : > { %p1704_p5 = pnand %p1703_p13, %p1697_p0 }
 0x203   : > { %1707 = shalt.err (!%p1704_p5)
}
 0x204   : > { %s1708_s15 = scalar_lea.hbm %s2234_s22, 512  ;;  %s1712_s9 = scalar_lea.hbm %s2398_s11, 1024 }
 0x205   : > { %p1709_p11 = scmp.ne.s32.totalorder %s2234_s22, %s1708_s15  ;;  %p1713_p6 = scmp.lt.s32.totalorder %s2234_s22, %s2398_s11 }
 0x206   : > { %p1714_p4 = scmp.lt.s32.totalorder %s1712_s9, %s1708_s15 }
 0x207   : > { %p1710_p2 = pnand %p1709_p11, %p2397_p12 }
 0x208   : > { %p1715_p8 = por %p1714_p4, %p1713_p6 }
 0x209   : > { %p1711_p1 = pneg %p1710_p2 }
 0x20b   : > { %p1716_p3 = pnand %p1715_p8, %p1711_p1 }
 0x20d   : > { %1719 = shalt.err (!%p1716_p3)
}
 0x20e   : > { %1402 = dma.vmem_to_hbm [thread:$0]  (%p2397_p12), %s2196_s27, 512, %s2234_s22, %s898_s3, %s1832_s26, %s1832_s26, %s1833_s14   ;;  %v888_v7 = vpop.permute.xlu1 %887  ;;  %v883_v8 = vpop.permute.xlu0 %882 }
 0x20f   : > { %s956_s30 = sshll.u32 %s2175_s16, 4  ;;  %1212 = vst.msk [vmem:[%s2175_s16 + $0x10] sm:$0xff] %vm657_vm1, %v888_v7  ;;  %1211 = vst.msk [vmem:[%s2175_s16 + $0x8] sm:$0xff] %vm657_vm1, %v883_v8  ;;  %s2399_s10 = sld [smem:[#allocation34_spill]]  ;;  %s2269_s30 = int_to_ptr.vmem [resolvable:$true] %s956_s30 }
 0x210   : > { %s1720_s27 = scalar_lea.vmem %s2269_s30, 512  ;;  %s1835_s22 = smov [#allocation16]  }
 0x211   : > { %p1721_p9 = scmp.ne.s32.totalorder %s2269_s30, %s1720_s27  ;;  %s1724_s3 = sshll.u32 %s1835_s22, 4  ;;  %s1725_s3 = int_to_ptr.vmem [resolvable:$false] %s1724_s3 }
 0x212   : > { %v893_v9 = vpop.permute.xlu0 %892  ;;  %s1726_s12 = scalar_lea.vmem %s1725_s3, 1024  ;;  %p1727_p10 = scmp.lt.s32.totalorder %s2269_s30, %s1725_s3 }
 0x213   : > { %1213 = vst.msk [vmem:[%s2175_s16 + $0x18] sm:$0xff] %vm657_vm1, %v893_v9  ;;  %p1722_p0 = pnand %p1721_p9, %p2397_p12  ;;  %p1728_p13 = scmp.lt.s32.totalorder %s1726_s12, %s1720_s27 }
 0x215   : > { %s2275_s28 = scalar_lea.hbm %s2399_s10, %s2181_s17  ;;  %p1723_p7 = pneg %p1722_p0 }
 0x216   : > { %p1729_p5 = por %p1728_p13, %p1727_p10 }
 0x218   : > { %p1730_p11 = pnand %p1729_p5, %p1723_p7 }
 0x21a   : > { %1733 = shalt.err (!%p1730_p11)
}
 0x21b   : > { %s1734_s17 = scalar_lea.hbm %s2275_s28, 512  ;;  %s1738_s29 = scalar_lea.hbm %s2399_s10, 1024 }
 0x21c   : > { %p1735_p2 = scmp.ne.s32.totalorder %s2275_s28, %s1734_s17  ;;  %p1739_p4 = scmp.lt.s32.totalorder %s2275_s28, %s2399_s10 }
 0x21d   : > { %p1740_p8 = scmp.lt.s32.totalorder %s1738_s29, %s1734_s17 }
 0x21e   : > { %p1736_p1 = pnand %p1735_p2, %p2397_p12 }
 0x21f   : > { %p1741_p3 = por %p1740_p8, %p1739_p4 }
 0x220   : > { %p1737_p6 = pneg %p1736_p1 }
 0x222   : > { %p1742_p9 = pnand %p1741_p3, %p1737_p6 }
 0x224   : > { %1745 = shalt.err (!%p1742_p9)
}
 0x225   : > { %1404 = dma.vmem_to_hbm [thread:$0]  (%p2397_p12), %s2269_s30, 512, %s2275_s28, %s2204_s20, %s1832_s26, %s1832_s26, %s1833_s14  }
 0x226 PF: > { %s2400_s1 = sld [smem:[#allocation23_spill]] }
 0x227   : > { %s2401_s5 = sld [smem:[#allocation26_spill]] }
 0x228   : > { %s2402_s13 = sld [smem:[#allocation25_spill]] }
 0x22c   : > { %s971_s23 = sand.u32 1, %s2400_s1  }
 0x22d   : > { %p2403_p0 = scmp.ne.s32.totalorder %s2401_s5, 0  ;;  %s972_s27 = scalar_lea.sflag [#allocation4], %s971_s23 }
 0x22e   : > { %p2404_p7 = scmp.ge.s32.totalorder %s2402_s13, 2 }
 0x230   : > { %p1429_p10 = pnand %p2404_p7, %p2403_p0 }
 0x232   : > { %p1430_p13 = pneg %p1429_p10 }
 0x234   : > { %1787 = dma.done.wait (%p1430_p13), %s972_s27, 512  }
 0x235   : > { %1789 = vsyncadd (%p1430_p13), %s972_s27, 4294966784  ;;  %s2405_s24 = sadd.s32 4294967294, %s2402_s13  }
 0x236   : > { %s980_s22 = sand.u32 1, %s2405_s24  }
 0x237   : > { %s981_s3 = scalar_lea.sflag [#allocation15], %s980_s22 }
 0x238   : > { %1791 = dma.done.wait (%p1430_p13), %s981_s3, 1024  }
 0x239   : > { %1793 = vsyncadd (%p1430_p13), %s981_s3, 4294966272  ;;  %s36_s22 = sadd.s32 1, %s2402_s13   ;;  %s2406_s20 = sld [smem:[#allocation28_spill]] }
 0x23a   : > { %p33_p12 = scmp.ge.s32.totalorder %s36_s22, 4   ;;  %s2407_s26 = sld [smem:[#allocation24_spill]] }
 0x23b   : > { %s2408_s21 = sld [smem:[#allocation27_spill]]  ;;  %s2409_s17 = smov %s1800_s18 }
 0x23c   : > { %s2410_s18 = smov %s1804_s19  ;;  %35 = sbr.rel (!%p33_p12) target bundleno = 19 (0x13), region = 178 }
 0x23f   : > { %s2411_s19 = smov %s2406_s20 }
 0x240   : > { %s2412_s20 = smov %s2407_s26 }
 0x241   :  { %995 = vsyncpa [#allocation3], 1 }
 0x242   :  { %997 = vsyncpa [#allocation3 + $0x1], 1 }
 0x243   :  { %998 = vsyncpa [#allocation6], 1 }
 0x244   :  { %1000 = vsyncpa [#allocation6 + $0x1], 1 }
 0x245   :  { %1001 = vsyncpa [#allocation9], 1 }
 0x246   :  { %1002 = vsyncpa [#allocation12], 1 }
 0x247   :  { %1003 = vsyncpa [#allocation4], 1 }
 0x248   :  { %1005 = vsyncpa [#allocation4 + $0x1], 1 }
 0x249   :  { %1006 = vsyncpa [#allocation15], 1 }
 0x24a   :  { %1008 = vsyncpa [#allocation15 + $0x1], 1 }

</bundles_post_ra>
